<compile_context>
chip_gen: v7x
topology: tpu7x:2x2x1
jax: 0.10.0
libtpu: 0.0.40
codegen_flags: <defaults>
</compile_context>

<pallas_src>
import jax
import jax.numpy as jnp
from jax.experimental import pallas as pl
from jax.experimental.pallas import tpu as pltpu


VMEM_LIMIT = 32 * 1024 * 1024
BN_EPS = 1e-5


def _round_up(x, m):
    return ((x + m - 1) // m) * m


def _pick_tile(dim, cands=(512, 384, 256, 128)):
    for t in cands:
        if dim % t == 0:
            return t
    return dim


def _m_tiles(M):
    """Return (padded M, M tile). M is tiled to <=256-row blocks."""
    if M <= 256:
        Mp = _round_up(M, 8)
        return Mp, Mp
    tm = 256
    return _round_up(M, tm), tm


# ----------------------------------------------------------------------------
# Kernel 1: tiled bf16 matmul with fused per-M-tile sum / sum-of-squares
# ----------------------------------------------------------------------------

_MM_CACHE = {}


def _build_conv_matmul(Mp, Kp, Np, tm, tk, tn):
    nm, nn, nk = Mp // tm, Np // tn, Kp // tk

    if nk == 1:
        # Single K slab: write output directly, no accumulator scratch.
        def kernel(a_ref, b_ref, y_ref, ps_ref, pq_ref):
            y = jnp.dot(a_ref[...], b_ref[...],
                        preferred_element_type=jnp.float32)
            y_ref[...] = y
            ps_ref[...] = jnp.sum(y, axis=0, keepdims=True).reshape(1, 1, tn)
            pq_ref[...] = jnp.sum(y * y, axis=0, keepdims=True).reshape(1, 1, tn)
        scratch = []
    else:
        def kernel(a_ref, b_ref, y_ref, ps_ref, pq_ref, acc_ref):
            k = pl.program_id(2)

            @pl.when(k == 0)
            def _():
                acc_ref[...] = jnp.zeros_like(acc_ref)

            acc_ref[...] += jnp.dot(a_ref[...], b_ref[...],
                                    preferred_element_type=jnp.float32)

            @pl.when(k == nk - 1)
            def _():
                y = acc_ref[...]
                y_ref[...] = y
                ps_ref[...] = jnp.sum(y, axis=0, keepdims=True).reshape(1, 1, tn)
                pq_ref[...] = jnp.sum(y * y, axis=0, keepdims=True).reshape(1, 1, tn)
        scratch = [pltpu.VMEM((tm, tn), jnp.float32)]

    call = pl.pallas_call(
        kernel,
        out_shape=(jax.ShapeDtypeStruct((Mp, Np), jnp.float32),
                   jax.ShapeDtypeStruct((nm, 1, Np), jnp.float32),
                   jax.ShapeDtypeStruct((nm, 1, Np), jnp.float32)),
        grid_spec=pltpu.PrefetchScalarGridSpec(
            num_scalar_prefetch=0,
            grid=(nm, nn, nk),
            in_specs=[pl.BlockSpec((tm, tk), lambda i, j, k: (i, k)),
                      pl.BlockSpec((tk, tn), lambda i, j, k: (k, j))],
            out_specs=(pl.BlockSpec((tm, tn), lambda i, j, k: (i, j)),
                       pl.BlockSpec((1, 1, tn), lambda i, j, k: (i, 0, j)),
                       pl.BlockSpec((1, 1, tn), lambda i, j, k: (i, 0, j))),
            scratch_shapes=scratch),
        compiler_params=pltpu.CompilerParams(
            dimension_semantics=("parallel", "parallel", "arbitrary"),
            vmem_limit_bytes=VMEM_LIMIT),
    )
    return jax.jit(call)


def _conv_matmul(a_bf16, b_bf16, Mp, Kp, Np, tm):
    tk = _pick_tile(Kp)
    tn = _pick_tile(Np, (512, 256, 128))
    key = (Mp, Kp, Np, tm, tk, tn)
    if key not in _MM_CACHE:
        _MM_CACHE[key] = _build_conv_matmul(Mp, Kp, Np, tm, tk, tn)
    return _MM_CACHE[key](a_bf16, b_bf16)


# ----------------------------------------------------------------------------
# Kernel 2: BatchNorm (batch statistics) + optional residual + activation
# ----------------------------------------------------------------------------

_APPLY_CACHE = {}


def _build_bn_apply(Mp, Np, tm, tn, inv_m, has_res, act):
    nm, nn = Mp // tm, Np // tn

    def kernel(*refs):
        if has_res:
            y_ref, s_ref, q_ref, g_ref, b_ref, r_ref, o_ref = refs
        else:
            y_ref, s_ref, q_ref, g_ref, b_ref, o_ref = refs
            r_ref = None
        mean = s_ref[...] * inv_m
        var = jnp.maximum(q_ref[...] * inv_m - mean * mean, 0.0)
        scale = g_ref[...] * jax.lax.rsqrt(var + BN_EPS)
        shift = b_ref[...] - mean * scale
        y = y_ref[...] * scale + shift
        if has_res:
            y = y + r_ref[...]
        if act == "relu":
            y = jnp.maximum(y, 0.0)
        o_ref[...] = y

    vec_spec = pl.BlockSpec((1, tn), lambda i, j: (0, j))
    in_specs = [pl.BlockSpec((tm, tn), lambda i, j: (i, j)),
                vec_spec, vec_spec, vec_spec, vec_spec]
    if has_res:
        in_specs.append(pl.BlockSpec((tm, tn), lambda i, j: (i, j)))

    call = pl.pallas_call(
        kernel,
        out_shape=jax.ShapeDtypeStruct((Mp, Np), jnp.float32),
        grid_spec=pltpu.PrefetchScalarGridSpec(
            num_scalar_prefetch=0,
            grid=(nm, nn),
            in_specs=in_specs,
            out_specs=pl.BlockSpec((tm, tn), lambda i, j: (i, j))),
        compiler_params=pltpu.CompilerParams(
            dimension_semantics=("parallel", "parallel"),
            vmem_limit_bytes=VMEM_LIMIT),
    )
    return jax.jit(call)


def _bn_apply(y, s, q, gamma, beta, residual, M_real, act, Mp, Np, tm):
    tn = _pick_tile(Np, (512, 256, 128))
    key = (Mp, Np, tm, tn, M_real, residual is not None, act)
    if key not in _APPLY_CACHE:
        _APPLY_CACHE[key] = _build_bn_apply(Mp, Np, tm, tn, 1.0 / M_real,
                                            residual is not None, act)
    args = [y, s, q, gamma, beta]
    if residual is not None:
        args.append(residual)
    return _APPLY_CACHE[key](*args)


# ----------------------------------------------------------------------------
# Pooling kernels
# ----------------------------------------------------------------------------

_POOL_CACHE = {}


def _maxpool_call(stacked, Mp, C, tm):
    key = ("max", stacked.shape, tm)
    if key not in _POOL_CACHE:
        KK = stacked.shape[0]
        nm = Mp // tm

        def kernel(x_ref, o_ref):
            o_ref[...] = jnp.max(x_ref[...], axis=0)

        call = pl.pallas_call(
            kernel,
            out_shape=jax.ShapeDtypeStruct((Mp, C), jnp.float32),
            grid_spec=pltpu.PrefetchScalarGridSpec(
                num_scalar_prefetch=0,
                grid=(nm,),
                in_specs=[pl.BlockSpec((KK, tm, C), lambda i: (0, i, 0))],
                out_specs=pl.BlockSpec((tm, C), lambda i: (i, 0))),
            compiler_params=pltpu.CompilerParams(
                dimension_semantics=("parallel",),
                vmem_limit_bytes=VMEM_LIMIT),
        )
        _POOL_CACHE[key] = jax.jit(call)
    return _POOL_CACHE[key](stacked)


def _avgpool_call(x3d):
    key = ("avg", x3d.shape)
    if key not in _POOL_CACHE:
        N, HW, C = x3d.shape

        def kernel(x_ref, o_ref):
            o_ref[...] = jnp.mean(x_ref[...], axis=1, keepdims=True)

        call = pl.pallas_call(
            kernel,
            out_shape=jax.ShapeDtypeStruct((N, 1, C), jnp.float32),
            grid_spec=pltpu.PrefetchScalarGridSpec(
                num_scalar_prefetch=0,
                grid=(N,),
                in_specs=[pl.BlockSpec((1, HW, C), lambda b: (b, 0, 0))],
                out_specs=pl.BlockSpec((1, 1, C), lambda b: (b, 0, 0))),
            compiler_params=pltpu.CompilerParams(
                dimension_semantics=("parallel",),
                vmem_limit_bytes=VMEM_LIMIT),
        )
        _POOL_CACHE[key] = jax.jit(call)
    return _POOL_CACHE[key](x3d)


# ----------------------------------------------------------------------------
# Fused heads kernel: one matmul for fc | fc_aux | fc_tmr, masked sigmoid
# ----------------------------------------------------------------------------

_HEADS_CACHE = {}


def _heads_call(feat_p, w, b, sig_mask):
    Bp, K = feat_p.shape
    Np = w.shape[1]
    key = (Bp, K, Np)
    if key not in _HEADS_CACHE:
        def kernel(x_ref, w_ref, b_ref, m_ref, o_ref):
            y = jnp.dot(x_ref[...], w_ref[...],
                        preferred_element_type=jnp.float32)
            y = y + b_ref[...]
            o_ref[...] = jnp.where(m_ref[...] > 0.5, jax.nn.sigmoid(y), y)

        call = pl.pallas_call(
            kernel,
            out_shape=jax.ShapeDtypeStruct((Bp, Np), jnp.float32),
            grid_spec=pltpu.PrefetchScalarGridSpec(
                num_scalar_prefetch=0,
                grid=(1,),
                in_specs=[pl.BlockSpec((Bp, K), lambda i: (0, 0)),
                          pl.BlockSpec((K, Np), lambda i: (0, 0)),
                          pl.BlockSpec((1, Np), lambda i: (0, 0)),
                          pl.BlockSpec((1, Np), lambda i: (0, 0))],
                out_specs=pl.BlockSpec((Bp, Np), lambda i: (0, 0))),
            compiler_params=pltpu.CompilerParams(
                dimension_semantics=("arbitrary",),
                vmem_limit_bytes=VMEM_LIMIT),
        )
        _HEADS_CACHE[key] = jax.jit(call)
    return _HEADS_CACHE[key](feat_p, w, b, sig_mask)


# ----------------------------------------------------------------------------
# Conv / pool layer wrappers (NHWC features, channels padded to x128)
# ----------------------------------------------------------------------------

def _im2col(x, kh, kw, stride, pad):
    n, h, w, c = x.shape
    xp = jnp.pad(x, ((0, 0), (pad, pad), (pad, pad), (0, 0)))
    ho = (h + 2 * pad - kh) // stride + 1
    wo = (w + 2 * pad - kw) // stride + 1
    cols = [xp[:, dy:dy + stride * ho:stride, dx:dx + stride * wo:stride, :]
            for dy in range(kh) for dx in range(kw)]
    patches = jnp.stack(cols, axis=3)              # (n, ho, wo, kh*kw, c)
    return patches.reshape(n * ho * wo, kh * kw * c), ho, wo


def conv_bn(x, cp, *, act="relu", residual=None):
    """conv (no bias) -> training-mode BN -> optional residual add -> act."""
    n = x.shape[0]
    kh, kw, stride, pad = cp["kh"], cp["kw"], cp["stride"], cp["pad"]
    if kh == 1 and kw == 1 and pad == 0:
        # 1x1 conv: no im2col, just a (possibly strided) channel matmul.
        xs = x[:, ::stride, ::stride, :]
        ho, wo = xs.shape[1], xs.shape[2]
        a = xs.reshape(n * ho * wo, xs.shape[3])
    else:
        a, ho, wo = _im2col(x, kh, kw, stride, pad)

    M = n * ho * wo
    Kp, Np = cp["B"].shape                         # weights pre-padded/cast
    Mp, tm = _m_tiles(M)
    pad_k = Kp - a.shape[1]                        # only non-zero for conv1 (K=147)
    pad_m = Mp - M
    if pad_k or pad_m:
        a = jnp.pad(a, ((0, pad_m), (0, pad_k)))
    a = a.astype(jnp.bfloat16)

    y, psum, psq = _conv_matmul(a, cp["B"], Mp, Kp, Np, tm)
    s = jnp.sum(psum, axis=0)                      # tiny cross-M-tile reduction
    q = jnp.sum(psq, axis=0)

    res2d = None
    if residual is not None:
        res2d = residual.reshape(M, Np)
        if pad_m:
            res2d = jnp.pad(res2d, ((0, pad_m), (0, 0)))

    out = _bn_apply(y, s, q, cp["gamma"], cp["beta"], res2d, M, act, Mp, Np, tm)
    if pad_m:
        out = out[:M]
    return out.reshape(n, ho, wo, Np)


def max_pool_3x3_s2_p1(x):
    n, h, w, c = x.shape
    neg = jnp.finfo(x.dtype).min
    xp = jnp.pad(x, ((0, 0), (1, 1), (1, 1), (0, 0)), constant_values=neg)
    ho = (h + 2 - 3) // 2 + 1
    wo = (w + 2 - 3) // 2 + 1
    cols = [xp[:, dy:dy + 2 * ho:2, dx:dx + 2 * wo:2, :]
            for dy in range(3) for dx in range(3)]
    stacked = jnp.stack(cols, axis=0).reshape(9, n * ho * wo, c)
    M = n * ho * wo
    Mp, tm = _m_tiles(M)
    if Mp != M:
        stacked = jnp.pad(stacked, ((0, 0), (0, Mp - M), (0, 0)))
    out = _maxpool_call(stacked, Mp, c, tm)
    return out[:M].reshape(n, ho, wo, c)


def global_avg_pool(x):
    n, h, w, c = x.shape
    return _avgpool_call(x.reshape(n, h * w, c)).reshape(n, c)


# ----------------------------------------------------------------------------
# ResNet50 backbone + heads
# ----------------------------------------------------------------------------

def bottleneck(x, blk):
    identity = x
    out = conv_bn(x, blk["conv1"], act="relu")
    out = conv_bn(out, blk["conv2"], act="relu")
    if "ds" in blk:
        identity = conv_bn(x, blk["ds"], act=None)
    # relu(bn3(conv3(out)) + identity), residual fused in the BN-apply kernel
    return conv_bn(out, blk["conv3"], act="relu", residual=identity)


def backbone(x_nhwc, prep):
    x = conv_bn(x_nhwc, prep["conv1"], act="relu")
    x = max_pool_3x3_s2_p1(x)
    for layer in prep["layers"]:
        for blk in layer:
            x = bottleneck(x, blk)
    return global_avg_pool(x)                      # (N, 2048)


def run_heads(feat, prep):
    B = feat.shape[0]
    Bp = _round_up(B, 8)
    fp = jnp.pad(feat, ((0, Bp - B), (0, 0)))
    out = _heads_call(fp, prep["head_w"], prep["head_b"], prep["head_sig"])[:B]
    nt, na = prep["num_target"], prep["num_aux"]
    return out[:, :nt], out[:, nt:nt + na], out[:, nt + na:nt + na + 1]


def forward(prep, x, x_nbr):
    """Training-branch semantics of FixedAuxAnnotateSpatialResNet50.forward."""
    bs, c, h, w = x.shape
    feat = backbone(jnp.transpose(x, (0, 2, 3, 1)), prep)
    output, target_output, tmr_output = run_heads(feat, prep)

    # TODO(synk): the PyTorch neighbor branch runs under torch.no_grad(); that
    # only affects autodiff, not the forward values reproduced here.
    num_nbr = x_nbr.shape[1]
    xn = x_nbr.reshape(bs * num_nbr, c, h, w)
    featn = backbone(jnp.transpose(xn, (0, 2, 3, 1)), prep)
    o_n, a_n, t_n = run_heads(featn, prep)
    return (output, target_output, tmr_output,
            o_n.reshape(bs, num_nbr, -1),
            a_n.reshape(bs, num_nbr, -1),
            t_n.reshape(bs, num_nbr, -1))


# ----------------------------------------------------------------------------
# Parameter init (ResNet50 shapes) + one-time preparation (pad/transpose/cast)
# ----------------------------------------------------------------------------

def init_params(key, num_target_genes, num_aux_genes):
    keys = iter(jax.random.split(key, 128))

    def conv_w(cout, cin, k):
        fan_in = cin * k * k
        return jax.random.normal(next(keys), (cout, cin, k, k),
                                 jnp.float32) * (2.0 / fan_in) ** 0.5

    def lin(cout, cin):
        scale = 1.0 / (cin ** 0.5)
        w = jax.random.uniform(next(keys), (cout, cin), jnp.float32, -scale, scale)
        b = jax.random.uniform(next(keys), (cout,), jnp.float32, -scale, scale)
        return w, b

    p = {"conv1_w": conv_w(64, 3, 7),
         "bn1_g": jnp.ones((64,), jnp.float32),
         "bn1_b": jnp.zeros((64,), jnp.float32)}
    layers = []
    in_c = 64
    for planes, nblocks, stride in ((64, 3, 1), (128, 4, 2),
                                    (256, 6, 2), (512, 3, 2)):
        blocks = []
        for bi in range(nblocks):
            s = stride if bi == 0 else 1
            blk = {"stride": s,
                   "conv1_w": conv_w(planes, in_c, 1),
                   "bn1_g": jnp.ones((planes,), jnp.float32),
                   "bn1_b": jnp.zeros((planes,), jnp.float32),
                   "conv2_w": conv_w(planes, planes, 3),
                   "bn2_g": jnp.ones((planes,), jnp.float32),
                   "bn2_b": jnp.zeros((planes,), jnp.float32),
                   "conv3_w": conv_w(planes * 4, planes, 1),
                   "bn3_g": jnp.ones((planes * 4,), jnp.float32),
                   "bn3_b": jnp.zeros((planes * 4,), jnp.float32)}
            if s != 1 or in_c != planes * 4:
                blk["ds_w"] = conv_w(planes * 4, in_c, 1)
                blk["ds_g"] = jnp.ones((planes * 4,), jnp.float32)
                blk["ds_b"] = jnp.zeros((planes * 4,), jnp.float32)
            blocks.append(blk)
            in_c = planes * 4
        layers.append(blocks)
    p["layers"] = layers
    p["fc_w"], p["fc_b"] = lin(num_target_genes, 2048)
    p["fc_aux_w"], p["fc_aux_b"] = lin(num_aux_genes, 2048)
    p["fc_tmr_w"], p["fc_tmr_b"] = lin(1, 2048)
    return p


def _prep_conv(w, gamma, beta, *, stride, pad, cin_stored):
    """Pre-pad/transpose a PyTorch conv weight to a bf16 (Kp, Np) matmul B."""
    cout, cin, kh, kw = w.shape
    cout_p = _round_up(cout, 128)
    K = kh * kw * cin_stored
    Kp = _round_up(K, 128)
    wp = jnp.zeros((cout_p, cin_stored, kh, kw), jnp.float32)
    wp = wp.at[:cout, :cin].set(w)                 # zero rows/cols for padding
    b = jnp.transpose(wp, (2, 3, 1, 0)).reshape(K, cout_p)
    if Kp != K:
        b = jnp.pad(b, ((0, Kp - K), (0, 0)))
    g = jnp.zeros((1, cout_p), jnp.float32).at[0, :cout].set(gamma)
    bt = jnp.zeros((1, cout_p), jnp.float32).at[0, :cout].set(beta)
    return {"B": b.astype(jnp.bfloat16), "gamma": g, "beta": bt,
            "kh": kh, "kw": kw, "stride": stride, "pad": pad}


def prepare_params(p, num_target_genes, num_aux_genes):
    prep = {"num_target": num_target_genes, "num_aux": num_aux_genes}
    prep["conv1"] = _prep_conv(p["conv1_w"], p["bn1_g"], p["bn1_b"],
                               stride=2, pad=3, cin_stored=3)
    layers = []
    in_stored = 128                                # conv1 out: 64ch padded to 128
    for layer in p["layers"]:
        blocks = []
        for blk in layer:
            planes = blk["conv1_w"].shape[0]
            s = blk["stride"]
            mid_stored = _round_up(planes, 128)
            out_stored = _round_up(planes * 4, 128)
            b = {"conv1": _prep_conv(blk["conv1_w"], blk["bn1_g"], blk["bn1_b"],
                                     stride=1, pad=0, cin_stored=in_stored),
                 "conv2": _prep_conv(blk["conv2_w"], blk["bn2_g"], blk["bn2_b"],
                                     stride=s, pad=1, cin_stored=mid_stored),
                 "conv3": _prep_conv(blk["conv3_w"], blk["bn3_g"], blk["bn3_b"],
                                     stride=1, pad=0, cin_stored=mid_stored)}
            if "ds_w" in blk:
                b["ds"] = _prep_conv(blk["ds_w"], blk["ds_g"], blk["ds_b"],
                                     stride=s, pad=0, cin_stored=in_stored)
            blocks.append(b)
            in_stored = out_stored
        layers.append(blocks)
    prep["layers"] = layers

    # Fused heads: columns ordered [fc | fc_aux | fc_tmr], padded to x128;
    # the sigmoid mask selects the tmr column inside the kernel.
    nh = num_target_genes + num_aux_genes + 1
    nh_p = _round_up(nh, 128)
    wcat = jnp.concatenate([p["fc_w"], p["fc_aux_w"], p["fc_tmr_w"]], axis=0)
    prep["head_w"] = jnp.zeros((2048, nh_p), jnp.float32).at[:, :nh].set(
        jnp.transpose(wcat))
    bcat = jnp.concatenate([p["fc_b"], p["fc_aux_b"], p["fc_tmr_b"]], axis=0)
    prep["head_b"] = jnp.zeros((1, nh_p), jnp.float32).at[0, :nh].set(bcat)
    prep["head_sig"] = jnp.zeros((1, nh_p), jnp.float32).at[0, nh - 1].set(1.0)
    return prep


# ----------------------------------------------------------------------------

if __name__ == "__main__":
    NUM_TARGET, NUM_AUX = 16, 8
    key = jax.random.PRNGKey(0)
    kp, kx, kn = jax.random.split(key, 3)

    raw = init_params(kp, NUM_TARGET, NUM_AUX)
    params = prepare_params(raw, NUM_TARGET, NUM_AUX)

    x = jax.random.normal(kx, (2, 3, 16, 16), jnp.float32)          # NCHW
    x_nbr = jax.random.normal(kn, (2, 2, 3, 16, 16), jnp.float32)   # (bs, nbr, C, H, W)

    outs = forward(params, x, x_nbr)
    outs = jax.block_until_ready(outs)

    assert outs[0].shape == (2, NUM_TARGET)
    assert outs[1].shape == (2, NUM_AUX)
    assert outs[2].shape == (2, 1)
    assert outs[3].shape == (2, 2, NUM_TARGET)
    assert outs[4].shape == (2, 2, NUM_AUX)
    assert outs[5].shape == (2, 2, 1)
    assert all(bool(jnp.all(jnp.isfinite(o))) for o in outs)

    print("KERNEL_OK")
</pallas_src>

<mosaic_0001>
module attributes {stable_mosaic.version = 11 : i64} {
  func.func @kernel(%arg0: i32, %arg1: i32, %arg2: i32, %arg3: memref<128x256xbf16, #tpu.memory_space<vmem>>, %arg4: memref<256x128xbf16, #tpu.memory_space<vmem>>, %arg5: memref<128x128xf32, #tpu.memory_space<vmem>>, %arg6: memref<1x1x128xf32, #tpu.memory_space<vmem>>, %arg7: memref<1x1x128xf32, #tpu.memory_space<vmem>>) attributes {dimension_semantics = [#tpu.dimension_semantics<parallel>, #tpu.dimension_semantics<parallel>, #tpu.dimension_semantics<arbitrary>], iteration_bounds = array<i64: 1, 1, 1>, scalar_prefetch = 0 : i64, scratch_operands = 0 : i64, tpu.core_type = #tpu.core_type<tc>, window_params = [{transform_indices = @transform_0, window_bounds = array<i64: 128, 256>}, {transform_indices = @transform_1, window_bounds = array<i64: 256, 128>}, {transform_indices = @transform_2, window_bounds = array<i64: 128, 128>}, {transform_indices = @transform_3, window_bounds = array<i64: 1, 1, 128>}, {transform_indices = @transform_4, window_bounds = array<i64: 1, 1, 128>}]} {
    %c0 = arith.constant 0 : index
    %c0_0 = arith.constant 0 : index
    %0 = vector.load %arg3[%c0, %c0_0] : memref<128x256xbf16, #tpu.memory_space<vmem>>, vector<128x256xbf16>
    %c0_1 = arith.constant 0 : index
    %c0_2 = arith.constant 0 : index
    %1 = vector.load %arg4[%c0_1, %c0_2] : memref<256x128xbf16, #tpu.memory_space<vmem>>, vector<256x128xbf16>
    %cst = arith.constant dense<0.000000e+00> : vector<128x128xf32>
    %2 = tpu.matmul %0, %1, %cst {dimension_numbers = #tpu.dot_dimension_numbers<[1], [0], [0], [1], [0, 0, 1, 1], [], []>} : vector<128x256xbf16>, vector<256x128xbf16>, vector<128x128xf32> -> vector<128x128xf32>
    %c0_3 = arith.constant 0 : index
    %c0_4 = arith.constant 0 : index
    %3 = vector.load %arg5[%c0_3, %c0_4] : memref<128x128xf32, #tpu.memory_space<vmem>>, vector<128x128xf32>
    tpu.vector_store %arg5[%c0_3, %c0_4], %2 {strides = array<i32>} : memref<128x128xf32, #tpu.memory_space<vmem>>, vector<128x128xf32>,
    %cst_5 = arith.constant dense<0.000000e+00> : vector<128xf32>
    %4 = vector.multi_reduction <add>, %2, %cst_5 [0] : vector<128x128xf32> to vector<128xf32>
    %5 = vector.shape_cast %4 : vector<128xf32> to vector<1x128xf32>
    %6 = vector.shape_cast %5 : vector<1x128xf32> to vector<1x1x128xf32>
    %c0_6 = arith.constant 0 : index
    %c0_7 = arith.constant 0 : index
    %c0_8 = arith.constant 0 : index
    %7 = vector.load %arg6[%c0_6, %c0_7, %c0_8] : memref<1x1x128xf32, #tpu.memory_space<vmem>>, vector<1x1x128xf32>
    tpu.vector_store %arg6[%c0_6, %c0_7, %c0_8], %6 {strides = array<i32>} : memref<1x1x128xf32, #tpu.memory_space<vmem>>, vector<1x1x128xf32>,
    %8 = arith.mulf %2, %2 : vector<128x128xf32>
    %cst_9 = arith.constant dense<0.000000e+00> : vector<128xf32>
    %9 = vector.multi_reduction <add>, %8, %cst_9 [0] : vector<128x128xf32> to vector<128xf32>
    %10 = vector.shape_cast %9 : vector<128xf32> to vector<1x128xf32>
    %11 = vector.shape_cast %10 : vector<1x128xf32> to vector<1x1x128xf32>
    %c0_10 = arith.constant 0 : index
    %c0_11 = arith.constant 0 : index
    %c0_12 = arith.constant 0 : index
    %12 = vector.load %arg7[%c0_10, %c0_11, %c0_12] : memref<1x1x128xf32, #tpu.memory_space<vmem>>, vector<1x1x128xf32>
    tpu.vector_store %arg7[%c0_10, %c0_11, %c0_12], %11 {strides = array<i32>} : memref<1x1x128xf32, #tpu.memory_space<vmem>>, vector<1x1x128xf32>,
    return
  }
  func.func @transform_0(%arg0: i32, %arg1: i32, %arg2: i32) -> (i32, i32) {
    %c0_i32 = arith.constant 0 : i32
    return %arg0, %arg2 : i32, i32
  }
  func.func @transform_1(%arg0: i32, %arg1: i32, %arg2: i32) -> (i32, i32) {
    %c0_i32 = arith.constant 0 : i32
    return %arg2, %arg1 : i32, i32
  }
  func.func @transform_2(%arg0: i32, %arg1: i32, %arg2: i32) -> (i32, i32) {
    %c0_i32 = arith.constant 0 : i32
    return %arg0, %arg1 : i32, i32
  }
  func.func @transform_3(%arg0: i32, %arg1: i32, %arg2: i32) -> (i32, i32, i32) {
    %c0_i32 = arith.constant 0 : i32
    %c0_i32_0 = arith.constant 0 : i32
    return %arg0, %c0_i32, %arg1 : i32, i32, i32
  }
  func.func @transform_4(%arg0: i32, %arg1: i32, %arg2: i32) -> (i32, i32, i32) {
    %c0_i32 = arith.constant 0 : i32
    %c0_i32_0 = arith.constant 0 : i32
    return %arg0, %c0_i32, %arg1 : i32, i32, i32
  }
}

</mosaic_0001>

<bundles_post_ra>
// kernel: tpu_custom_call.1
= control target key start
LH: loop header
LB: loop body
LE: loop exit
PB: predicated region body
PF: predicated region fallthrough
CT: control target
= control target key end

     0   :  { %10 = vsyncpa [#allocation3], 0  ;;  %s904_s0 = inlined_call_operand.hbm [shape: bf16[128,256], index: 0, kind: input, shape index: {}]   ;;  %s905_s1 = inlined_call_operand.hbm [shape: bf16[256,128], index: 1, kind: input, shape index: {}]   ;;  %s906_s2 = inlined_call_operand.hbm [shape: f32[128,128], index: 2, kind: output, shape index: {0}]   ;;  %s907_s3 = inlined_call_operand.hbm [shape: f32[1,1,128], index: 3, kind: output, shape index: {1}]   ;;  %s908_s4 = inlined_call_operand.hbm [shape: f32[1,1,128], index: 4, kind: output, shape index: {2}]  }
   0x1   :  { %11 = vsyncpa [#allocation6], 0 }
   0x2   :  { %12 = vsyncpa [#allocation4], 0 }
   0x3   :  { %13 = vsyncpa [#allocation9], 0  ;;  %s766_s15 = smov [#allocation2]   ;;  %s648_s19 = scalar_lea.hbm %s904_s0, 2048 }
   0x4   :  { %s19_s16 = sshll.u32 %s766_s15, 4  ;;  %p649_p0 = scmp.ne.s32.totalorder %s904_s0, %s648_s19  ;;  %s20_s16 = int_to_ptr.vmem [resolvable:$true] %s19_s16 }
   0x5   :  { %p652_p1 = scmp.lt.u32.totalorder %s648_s19, %s904_s0 }
   0x7   :  { %p654_p2 = pnand %p652_p1, %p649_p0 }
   0x9   :  { %657 = shalt.err (!%p654_p2)
}
   0xa   :  { %s658_s24 = scalar_lea.vmem %s20_s16, 2048  ;;  %p663_p4 = scmp.lt.s32.totalorder %s20_s16, %s20_s16 }
   0xb   :  { %p659_p3 = scmp.ne.s32.totalorder %s20_s16, %s658_s24  ;;  %p664_p5 = scmp.lt.s32.totalorder %s658_s24, %s658_s24 }
   0xd   :  { %p665_p6 = por %p664_p5, %p663_p4 }
   0xf   :  { %p666_p7 = pnand %p665_p6, %p659_p3 }
  0x11   :  { %669 = shalt.err (!%p666_p7)
}
  0x12   :  { %s767_s25 = smov 128   ;;  %s768_s26 = smov 8  }
  0x13   :  { %25 = dma.hbm_to_vmem [thread:$0]  %s904_s0, 2048, %s20_s16, [#allocation3], %s767_s25, %s767_s25, %s768_s26  }
  0x14   :  { %s769_s29 = smov [#allocation5]   ;;  %s670_s7 = scalar_lea.hbm %s905_s1, 2048 }
  0x15   :  { %s31_s30 = sshll.u32 %s769_s29, 4  ;;  %p671_p8 = scmp.ne.s32.totalorder %s905_s1, %s670_s7  ;;  %s32_s30 = int_to_ptr.vmem [resolvable:$true] %s31_s30 }
  0x16   :  { %p674_p9 = scmp.lt.u32.totalorder %s670_s7, %s905_s1 }
  0x18   :  { %p676_p10 = pnand %p674_p9, %p671_p8 }
  0x1a   :  { %679 = shalt.err (!%p676_p10)
}
  0x1b   :  { %s680_s12 = scalar_lea.vmem %s32_s30, 2048  ;;  %p685_p12 = scmp.lt.s32.totalorder %s32_s30, %s32_s30 }
  0x1c   :  { %p681_p11 = scmp.ne.s32.totalorder %s32_s30, %s680_s12  ;;  %p686_p13 = scmp.lt.s32.totalorder %s680_s12, %s680_s12 }
  0x1e   :  { %p687_p0 = por %p686_p13, %p685_p12 }
  0x20   :  { %p688_p1 = pnand %p687_p0, %p681_p11 }
  0x22   :  { %691 = shalt.err (!%p688_p1)
}
  0x23   :  { %s770_s0 = smov 64   ;;  %s771_s13 = smov 4  }
  0x24   :  { %37 = dma.hbm_to_vmem [thread:$0]  %s905_s1, 2048, %s32_s30, [#allocation6], %s770_s0, %s770_s0, %s771_s13  }
  0x25   :  { %758 = dma.done.wait [#allocation3], 2048  }
  0x26   :  { %759 = vsyncadd [#allocation3], 4294965248 }
  0x27   :  { %760 = dma.done.wait [#allocation6], 2048  }
  0x28   :  { %761 = vsyncadd [#allocation6], 4294965248  ;;  %v608_v0 = vld [vmem:[#allocation5 + $0x40] sm:$0xff]   ;;  %v610_v2 = vld [vmem:[#allocation5 + $0x48] sm:$0xff]   ;;  %s772_s1 = smov [#allocation7]  }
  0x29   :  { %v609_v1 = vld [vmem:[#allocation5] sm:$0xff]   ;;  %519 = vmatprep.subr.bf16.mxu0 %v608_v0  ;;  %583 = vmatprep.subr.bf16.mxu1 %v608_v0  ;;  %v611_v3 = vld [vmem:[#allocation5 + $0x8] sm:$0xff]   ;;  %v612_v4 = vld [vmem:[#allocation5 + $0x50] sm:$0xff]   ;;  %s447_s16 = sshll.u32 %s772_s1, 4  ;;  %s448_s16 = int_to_ptr.vmem [resolvable:$true] %s447_s16 }
  0x2a   :  { %520 = vmatpush3.bf16.msra.mxu0 %v609_v1  ;;  %591 = vmatpush3.bf16.msra.mxu1 %v609_v1  ;;  %v613_v5 = vld [vmem:[#allocation5 + $0x10] sm:$0xff]   ;;  %v614_v6 = vld [vmem:[#allocation5 + $0x58] sm:$0xff]   ;;  %v616_v8 = vld [vmem:[#allocation5 + $0x60] sm:$0xff]   ;;  %s692_s17 = scalar_lea.vmem %s448_s16, 2048  ;;  %p697_p3 = scmp.lt.s32.totalorder %s448_s16, %s448_s16 }
  0x2b   :  { %521 = vmatprep.subr.bf16.mxu0 %v610_v2  ;;  %584 = vmatprep.subr.bf16.mxu1 %v610_v2  ;;  %v615_v7 = vld [vmem:[#allocation5 + $0x18] sm:$0xff]   ;;  %v617_v9 = vld [vmem:[#allocation5 + $0x20] sm:$0xff]   ;;  %v618_v10 = vld [vmem:[#allocation5 + $0x68] sm:$0xff]   ;;  %p693_p2 = scmp.ne.s32.totalorder %s448_s16, %s692_s17  ;;  %p698_p4 = scmp.lt.s32.totalorder %s692_s17, %s692_s17 }
  0x2c   :  { %v626_v11 = vld [vmem:[#allocation2 + $0x4] ss:$8 sps:$4 sm:$0xff]   ;;  %v620_v14 = vld [vmem:[#allocation5 + $0x70] sm:$0xff]   ;;  %v622_v16 = vld [vmem:[#allocation5 + $0x78] sm:$0xff]  }
  0x2d   :  { %v619_v12 = vld [vmem:[#allocation5 + $0x28] sm:$0xff]   ;;  %301 = vmatprep.mubr.bf16.mxu0 %v626_v11  ;;  %v621_v15 = vld [vmem:[#allocation5 + $0x30] sm:$0xff]   ;;  %v623_v17 = vld [vmem:[#allocation5 + $0x38] sm:$0xff]   ;;  %p699_p5 = por %p698_p4, %p697_p3 }
  0x2e   :  { %522 = vmatpush3.bf16.msra.mxu0 %v611_v3  ;;  %592 = vmatpush3.bf16.msra.mxu1 %v611_v3  ;;  %v632_v13 = vld [vmem:[#allocation2 + $0x44] ss:$8 sps:$4 sm:$0xff]   ;;  %v624_v18 = vld [vmem:[#allocation2] ss:$8 sps:$4 sm:$0xff]   ;;  %v627_v20 = vld [vmem:[#allocation2 + $0x14] ss:$8 sps:$4 sm:$0xff]  }
  0x2f   :  { %523 = vmatprep.subr.bf16.mxu0 %v612_v4  ;;  %585 = vmatprep.subr.bf16.mxu1 %v612_v4  ;;  %v630_v19 = vld [vmem:[#allocation2 + $0x40] ss:$8 sps:$4 sm:$0xff]   ;;  %v636_v21 = vld [vmem:[#allocation2 + $0x54] ss:$8 sps:$4 sm:$0xff]   ;;  %v629_v22 = vld [vmem:[#allocation2 + $0x10] ss:$8 sps:$4 sm:$0xff]   ;;  %p700_p6 = pnand %p699_p5, %p693_p2 }
  0x30   :  { %333 = vmatprep.mubr.bf16.mxu1 %v632_v13  ;;  %v638_v23 = vld [vmem:[#allocation2 + $0x50] ss:$8 sps:$4 sm:$0xff]   ;;  %v633_v24 = vld [vmem:[#allocation2 + $0x24] ss:$8 sps:$4 sm:$0xff]   ;;  %v635_v26 = vld [vmem:[#allocation2 + $0x20] ss:$8 sps:$4 sm:$0xff]  }
  0x31   :  { %v642_v25 = vld [vmem:[#allocation2 + $0x64] ss:$8 sps:$4 sm:$0xff]   ;;  %v644_v27 = vld [vmem:[#allocation2 + $0x60] ss:$8 sps:$4 sm:$0xff]   ;;  %v639_v28 = vld [vmem:[#allocation2 + $0x34] ss:$8 sps:$4 sm:$0xff]  }
  0x32   :  { %524 = vmatpush3.bf16.msra.mxu0 %v613_v5  ;;  %593 = vmatpush3.bf16.msra.mxu1 %v613_v5  ;;  %v645_v29 = vld [vmem:[#allocation2 + $0x74] ss:$8 sps:$4 sm:$0xff]   ;;  %v641_v30 = vld [vmem:[#allocation2 + $0x30] ss:$8 sps:$4 sm:$0xff]  }
  0x33   :  { %525 = vmatprep.subr.bf16.mxu0 %v614_v6  ;;  %586 = vmatprep.subr.bf16.mxu1 %v614_v6  ;;  %v647_v31 = vld [vmem:[#allocation2 + $0x70] ss:$8 sps:$4 sm:$0xff]  }
  0x36   :  { %526 = vmatpush3.bf16.msra.mxu0 %v615_v7  ;;  %594 = vmatpush3.bf16.msra.mxu1 %v615_v7 }
  0x37   :  { %527 = vmatprep.subr.bf16.mxu0 %v616_v8  ;;  %587 = vmatprep.subr.bf16.mxu1 %v616_v8 }
  0x3a   :  { %528 = vmatpush3.bf16.msra.mxu0 %v617_v9  ;;  %595 = vmatpush3.bf16.msra.mxu1 %v617_v9 }
  0x3b   :  { %529 = vmatprep.subr.bf16.mxu0 %v618_v10  ;;  %588 = vmatprep.subr.bf16.mxu1 %v618_v10 }
  0x3e   :  { %530 = vmatpush3.bf16.msra.mxu0 %v619_v12  ;;  %596 = vmatpush3.bf16.msra.mxu1 %v619_v12 }
  0x3f   :  { %531 = vmatprep.subr.bf16.mxu0 %v620_v14  ;;  %589 = vmatprep.subr.bf16.mxu1 %v620_v14 }
  0x42   :  { %532 = vmatpush3.bf16.msra.mxu0 %v621_v15  ;;  %597 = vmatpush3.bf16.msra.mxu1 %v621_v15 }
  0x43   :  { %533 = vmatprep.subr.bf16.mxu0 %v622_v16  ;;  %590 = vmatprep.subr.bf16.mxu1 %v622_v16 }
  0x46   :  { %534 = vmatpush3.bf16.msra.mxu0 %v623_v17  ;;  %598 = vmatpush3.bf16.msra.mxu1 %v623_v17 }
  0x49   :  { %302 = vmatmul.mubr.bf16.vlgmr.msra.gmra.mrb[0].mxu0 %v624_v18  ;;  %334 = vmatmul.mubr.bf16.vlgmr.msra.gmra.mrb[0].mxu1 %v630_v19 }
  0x4a   :  { %309 = vmatprep.mubr.bf16.mxu0 %v627_v20  ;;  %341 = vmatprep.mubr.bf16.mxu1 %v636_v21 }
  0x51   :  { %310 = vmatmul.mubr.bf16.gmra.mrb[4].mxu0 %v629_v22  ;;  %342 = vmatmul.mubr.bf16.gmra.mrb[4].mxu1 %v638_v23 }
  0x52   :  { %317 = vmatprep.mubr.bf16.mxu0 %v633_v24  ;;  %349 = vmatprep.mubr.bf16.mxu1 %v642_v25 }
  0x59   :  { %318 = vmatmul.mubr.bf16.gmra.mrb[8].mxu0 %v635_v26  ;;  %350 = vmatmul.mubr.bf16.gmra.mrb[8].mxu1 %v644_v27 }
  0x5a   :  { %325 = vmatprep.mubr.bf16.mxu0 %v639_v28  ;;  %357 = vmatprep.mubr.bf16.mxu1 %v645_v29 }
  0x61   :  { %326 = vmatmul.mubr.bf16.gmra.mrb[12].mxu0 %v641_v30  ;;  %358 = vmatmul.mubr.bf16.gmra.mrb[12].mxu1 %v647_v31 }
 0x11c   :  { %v535_v32 = vpop.f32.mrb[0].mxu0  ;;  %v559_v33 = vpop.f32.mrb[0].mxu1 }
 0x11d   :  { %v536_v34 = vpop.f32.mrb[1].mxu0  ;;  %v560_v35 = vpop.f32.mrb[1].mxu1 }
 0x11e   :  { %v537_v36 = vadd.f32 %v536_v34, %v535_v32  ;;  %v538_v37 = vpop.f32.mrb[2].mxu0  ;;  %v827_v38 = vadd.f32 %v560_v35, %v559_v33  ;;  %v562_v39 = vpop.f32.mrb[2].mxu1 }
 0x11f   :  { %v539_v40 = vpop.f32.mrb[3].mxu0  ;;  %v563_v41 = vpop.f32.mrb[3].mxu1 }
 0x120   :  { %366 = vst [vmem:[#allocation7] sm:$0xff] %v537_v36  ;;  %v540_v42 = vadd.f32 %v539_v40, %v538_v37  ;;  %374 = vst [vmem:[#allocation7 + $0x40] sm:$0xff] %v827_v38  ;;  %v830_v43 = vadd.f32 %v563_v41, %v562_v39  ;;  %v404_v44 = vmul.f32 %v537_v36, %v537_v36 }
 0x121   :  { %v412_v37 = vmul.f32 %v827_v38, %v827_v38 }
 0x122   :  { %367 = vst [vmem:[#allocation7 + $0x8] sm:$0xff] %v540_v42  ;;  %v382_v45 = vadd.f32 %v540_v42, %v537_v36  ;;  %v405_v46 = vmul.f32 %v540_v42, %v540_v42  ;;  %375 = vst [vmem:[#allocation7 + $0x48] sm:$0xff] %v830_v43 }
 0x124   :  { %v420_v47 = vadd.f32 %v405_v46, %v404_v44  ;;  %v541_v48 = vpop.f32.mrb[4].mxu0  ;;  %v565_v49 = vpop.f32.mrb[4].mxu1 }
 0x125   :  { %v542_v50 = vpop.f32.mrb[5].mxu0  ;;  %v566_v51 = vpop.f32.mrb[5].mxu1 }
 0x126   :  { %v543_v52 = vadd.f32 %v542_v50, %v541_v48  ;;  %v544_v53 = vpop.f32.mrb[6].mxu0  ;;  %v833_v54 = vadd.f32 %v566_v51, %v565_v49  ;;  %v568_v55 = vpop.f32.mrb[6].mxu1 }
 0x127   :  { %v545_v56 = vpop.f32.mrb[7].mxu0  ;;  %v569_v57 = vpop.f32.mrb[7].mxu1 }
 0x128   :  { %368 = vst [vmem:[#allocation7 + $0x10] sm:$0xff] %v543_v52  ;;  %v383_v58 = vadd.f32 %v543_v52, %v382_v45  ;;  %v406_v59 = vmul.f32 %v543_v52, %v543_v52  ;;  %v546_v60 = vadd.f32 %v545_v56, %v544_v53  ;;  %376 = vst [vmem:[#allocation7 + $0x50] sm:$0xff] %v833_v54 }
 0x129   :  { %v836_v61 = vadd.f32 %v569_v57, %v568_v55 }
 0x12a   :  { %v421_v62 = vadd.f32 %v420_v47, %v406_v59  ;;  %369 = vst [vmem:[#allocation7 + $0x18] sm:$0xff] %v546_v60  ;;  %v384_v63 = vadd.f32 %v546_v60, %v383_v58  ;;  %v407_v0 = vmul.f32 %v546_v60, %v546_v60 }
 0x12b   :  { %377 = vst [vmem:[#allocation7 + $0x58] sm:$0xff] %v836_v61 }
 0x12c   :  { %v422_v1 = vadd.f32 %v421_v62, %v407_v0  ;;  %v547_v2 = vpop.f32.mrb[8].mxu0  ;;  %v571_v3 = vpop.f32.mrb[8].mxu1 }
 0x12d   :  { %v548_v4 = vpop.f32.mrb[9].mxu0  ;;  %v572_v5 = vpop.f32.mrb[9].mxu1 }
 0x12e   :  { %v549_v6 = vadd.f32 %v548_v4, %v547_v2  ;;  %v550_v7 = vpop.f32.mrb[10].mxu0  ;;  %v839_v8 = vadd.f32 %v572_v5, %v571_v3  ;;  %v574_v9 = vpop.f32.mrb[10].mxu1 }
 0x12f   :  { %v551_v10 = vpop.f32.mrb[11].mxu0  ;;  %v575_v11 = vpop.f32.mrb[11].mxu1 }
 0x130   :  { %370 = vst [vmem:[#allocation7 + $0x20] sm:$0xff] %v549_v6  ;;  %v385_v12 = vadd.f32 %v549_v6, %v384_v63  ;;  %v408_v13 = vmul.f32 %v549_v6, %v549_v6  ;;  %v552_v14 = vadd.f32 %v551_v10, %v550_v7  ;;  %378 = vst [vmem:[#allocation7 + $0x60] sm:$0xff] %v839_v8 }
 0x131   :  { %v576_v15 = vadd.f32 %v575_v11, %v574_v9 }
 0x132   :  { %v423_v16 = vadd.f32 %v422_v1, %v408_v13  ;;  %371 = vst [vmem:[#allocation7 + $0x28] sm:$0xff] %v552_v14  ;;  %v386_v17 = vadd.f32 %v552_v14, %v385_v12  ;;  %v409_v18 = vmul.f32 %v552_v14, %v552_v14 }
 0x133   :  { %379 = vst [vmem:[#allocation7 + $0x68] sm:$0xff] %v576_v15 }
 0x134   :  { %v424_v19 = vadd.f32 %v423_v16, %v409_v18  ;;  %v553_v20 = vpop.f32.mrb[12].mxu0  ;;  %v577_v21 = vpop.f32.mrb[12].mxu1 }
 0x135   :  { %v554_v22 = vpop.f32.mrb[13].mxu0  ;;  %v578_v23 = vpop.f32.mrb[13].mxu1 }
 0x136   :  { %v555_v24 = vadd.f32 %v554_v22, %v553_v20  ;;  %v556_v25 = vpop.f32.mrb[14].mxu0  ;;  %v579_v26 = vadd.f32 %v578_v23, %v577_v21  ;;  %v580_v27 = vpop.f32.mrb[14].mxu1 }
 0x137   :  { %v557_v28 = vpop.f32.mrb[15].mxu0  ;;  %v581_v29 = vpop.f32.mrb[15].mxu1 }
 0x138   :  { %372 = vst [vmem:[#allocation7 + $0x30] sm:$0xff] %v555_v24  ;;  %v387_v30 = vadd.f32 %v555_v24, %v386_v17  ;;  %v410_v31 = vmul.f32 %v555_v24, %v555_v24  ;;  %v558_v32 = vadd.f32 %v557_v28, %v556_v25  ;;  %380 = vst [vmem:[#allocation7 + $0x70] sm:$0xff] %v579_v26 }
 0x139   :  { %v582_v33 = vadd.f32 %v581_v29, %v580_v27 }
 0x13a   :  { %v425_v34 = vadd.f32 %v424_v19, %v410_v31  ;;  %373 = vst [vmem:[#allocation7 + $0x38] sm:$0xff] %v558_v32  ;;  %v388_v35 = vadd.f32 %v558_v32, %v387_v30  ;;  %v411_v36 = vmul.f32 %v558_v32, %v558_v32 }
 0x13b   :  { %381 = vst [vmem:[#allocation7 + $0x78] sm:$0xff] %v582_v33 }
 0x13c   :  { %v389_v39 = vadd.f32 %v827_v38, %v388_v35  ;;  %v426_v40 = vadd.f32 %v425_v34, %v411_v36 }
 0x13d   :  { %703 = shalt.err (!%p700_p6)
}
 0x13e   :  { %s704_s20 = scalar_lea.hbm %s906_s2, 2048 }
 0x13f   :  { %p705_p7 = scmp.ne.s32.totalorder %s906_s2, %s704_s20  ;;  %p708_p8 = scmp.lt.u32.totalorder %s704_s20, %s906_s2 }
 0x141   :  { %p710_p9 = pnand %p708_p8, %p705_p7 }
 0x143   :  { %713 = shalt.err (!%p710_p9)
}
 0x144   :  { %453 = dma.vmem_to_hbm [thread:$0]  %s448_s16, 2048, %s906_s2, [#allocation4], %s767_s25, %s767_s25, %s768_s26   ;;  %v413_v38 = vmul.f32 %v830_v43, %v830_v43  ;;  %v390_v41 = vadd.f32 %v830_v43, %v389_v39  ;;  %v427_v42 = vadd.f32 %v426_v40, %v412_v37  ;;  %v414_v44 = vmul.f32 %v833_v54, %v833_v54 }
 0x145   :  { %v415_v47 = vmul.f32 %v836_v61, %v836_v61  ;;  %v416_v51 = vmul.f32 %v839_v8, %v839_v8  ;;  %v417_v55 = vmul.f32 %v576_v15, %v576_v15  ;;  %v418_v56 = vmul.f32 %v579_v26, %v579_v26  ;;  %s773_s2 = smov [#allocation8]   ;;  %s774_s26 = smov [#allocation10]  }
 0x146   :  { %v428_v45 = vadd.f32 %v427_v42, %v413_v38  ;;  %v391_v46 = vadd.f32 %v833_v54, %v390_v41  ;;  %v419_v60 = vmul.f32 %v582_v33, %v582_v33  ;;  %s460_s25 = sshll.u32 %s773_s2, 4  ;;  %s470_s29 = sshll.u32 %s774_s26, 4  ;;  %s461_s25 = int_to_ptr.vmem [resolvable:$true] %s460_s25  ;;  %s872_s29 = int_to_ptr.vmem [resolvable:$true] %s470_s29 }
 0x147   :  { %s714_s30 = scalar_lea.vmem %s461_s25, 16  ;;  %s718_s5 = scalar_lea.vmem %s461_s25, 32 }
 0x148   :  { %v392_v48 = vadd.f32 %v836_v61, %v391_v46  ;;  %v429_v49 = vadd.f32 %v428_v45, %v414_v44  ;;  %p715_p10 = scmp.ne.s32.totalorder %s461_s25, %s714_s30  ;;  %p719_p11 = scmp.lt.s32.totalorder %s461_s25, %s461_s25 }
 0x149   :  { %p720_p12 = scmp.lt.s32.totalorder %s718_s5, %s714_s30 }
 0x14a   :  { %v393_v50 = vadd.f32 %v839_v8, %v392_v48  ;;  %v430_v52 = vadd.f32 %v429_v49, %v415_v47 }
 0x14b   :  { %p721_p13 = por %p720_p12, %p719_p11 }
 0x14c   :  { %v431_v43 = vadd.f32 %v430_v52, %v416_v51  ;;  %v394_v53 = vadd.f32 %v576_v15, %v393_v50 }
 0x14d   :  { %p722_p0 = pnand %p721_p13, %p715_p10 }
 0x14e   :  { %v432_v57 = vadd.f32 %v431_v43, %v417_v55  ;;  %v395_v58 = vadd.f32 %v579_v26, %v394_v53 }
 0x150   :  { %v433_v59 = vadd.f32 %v432_v57, %v418_v56  ;;  %v396_v54 = vadd.f32 %v582_v33, %v395_v58 }
 0x152   :  { %v397_v62 = vrot.slane %v396_v54, 4  ;;  %v434_v63 = vadd.f32 %v433_v59, %v419_v60 }
 0x154   :  { %v398_v0 = vadd.f32 %v397_v62, %v396_v54  ;;  %v435_v61 = vrot.slane %v434_v63, 4 }
 0x156   :  { %v436_v1 = vadd.f32 %v435_v61, %v434_v63  ;;  %v399_v2 = vrot.slane %v398_v0, 2 }
 0x158   :  { %v400_v3 = vadd.f32 %v399_v2, %v398_v0  ;;  %v437_v4 = vrot.slane %v436_v1, 2 }
 0x15a   :  { %v401_v5 = vrot.slane %v400_v3, 1  ;;  %v438_v6 = vadd.f32 %v437_v4, %v436_v1 }
 0x15c   :  { %v402_v7 = vadd.f32 %v401_v5, %v400_v3  ;;  %v439_v8 = vrot.slane %v438_v6, 1 }
 0x15e   :  { %403 = vst [vmem:[#allocation8] sm:$0x1] %v402_v7  ;;  %v440_v9 = vadd.f32 %v439_v8, %v438_v6 }
 0x15f   :  { %725 = shalt.err (!%p722_p0)
}
 0x160   :  { %s726_s8 = scalar_lea.hbm %s907_s3, 16 }
 0x161   :  { %p727_p1 = scmp.ne.s32.totalorder %s907_s3, %s726_s8  ;;  %p730_p2 = scmp.lt.u32.totalorder %s726_s8, %s907_s3 }
 0x163   :  { %p732_p3 = pnand %p730_p2, %p727_p1 }
 0x165   :  { %735 = shalt.err (!%p732_p3)
}
 0x166   :  { %463 = dma.vmem_to_hbm [thread:$0]  %s461_s25, 16, %s907_s3, [#allocation9]   ;;  %441 = vst [vmem:[#allocation10] sm:$0x1] %v440_v9 }
 0x167   :  { %s736_s14 = scalar_lea.vmem %s872_s29, 16  ;;  %s740_s15 = scalar_lea.vmem %s872_s29, 32 }
 0x168   :  { %p737_p4 = scmp.ne.s32.totalorder %s872_s29, %s736_s14  ;;  %p741_p5 = scmp.lt.s32.totalorder %s872_s29, %s872_s29 }
 0x169   :  { %p742_p6 = scmp.lt.s32.totalorder %s740_s15, %s736_s14 }
 0x16b   :  { %p743_p7 = por %p742_p6, %p741_p5 }
 0x16d   :  { %p744_p8 = pnand %p743_p7, %p737_p4 }
 0x16f   :  { %747 = shalt.err (!%p744_p8)
}
 0x170   :  { %s748_s17 = scalar_lea.hbm %s908_s4, 16 }
 0x171   :  { %p749_p9 = scmp.ne.s32.totalorder %s908_s4, %s748_s17  ;;  %p752_p10 = scmp.lt.u32.totalorder %s748_s17, %s908_s4 }
 0x173   :  { %p754_p11 = pnand %p752_p10, %p749_p9 }
 0x175   :  { %757 = shalt.err (!%p754_p11)
}
 0x176   :  { %473 = dma.vmem_to_hbm [thread:$0]  %s872_s29, 16, %s908_s4, [#allocation9]  }
 0x177   :  { %762 = dma.done.wait [#allocation4], 2048  }
 0x178   :  { %763 = vsyncadd [#allocation4], 4294965248 }
 0x179   :  { %764 = dma.done.wait [#allocation9], 32  }
 0x17a   :  { %765 = vsyncadd [#allocation9], 4294967264 }
 0x17b   :  { %483 = vsyncpa [#allocation3], 1 }
 0x17c   :  { %484 = vsyncpa [#allocation6], 1 }
 0x17d   :  { %485 = vsyncpa [#allocation4], 1 }
 0x17e   :  { %486 = vsyncpa [#allocation9], 1 }

</bundles_post_ra>
